<compile_context>
chip_gen: v6e
topology: v6e:2x2x1
jax: 0.10.0
libtpu: 0.0.40
codegen_flags: <defaults>
</compile_context>

<pallas_src>
import functools
import math

import jax
import jax.numpy as jnp
from jax.experimental import pallas as pl
from jax.experimental.pallas import tpu as pltpu


def _round_up(x, m):
    return ((x + m - 1) // m) * m


# ---------------------------------------------------------------------------
# Kernel: one (tile_m, f_pad) output slab of adj @ support (+ bias, ReLU),
# iterating only over the nonzero adj column-blocks of this row tile.
# ---------------------------------------------------------------------------
def _gcn_block_kernel(bids_ref, cnts_ref,            # scalar prefetch (SMEM)
                      adj_ref, sup_ref, bias_ref,    # inputs (VMEM)
                      o_ref,                         # output (VMEM)
                      acc_ref,                       # scratch (VMEM, f32)
                      *, apply_relu, tile_k, support_resident):
    i = pl.program_id(0)
    k = pl.program_id(1)

    @pl.when(k == 0)
    def _():
        acc_ref[...] = jnp.zeros_like(acc_ref)

    # Only accumulate for real (non-padded) nonzero blocks of this row tile.
    @pl.when(k < cnts_ref[i])
    def _():
        if support_resident:
            bid = bids_ref[i, k]
            start = pl.multiple_of(bid * tile_k, tile_k)
            s = sup_ref[pl.ds(start, tile_k), :]
        else:
            s = sup_ref[...]
        acc_ref[...] += jnp.dot(adj_ref[...], s,
                                preferred_element_type=jnp.float32)

    @pl.when(k == pl.num_programs(1) - 1)
    def _():
        out = acc_ref[...] + bias_ref[...]
        if apply_relu:
            out = jnp.maximum(out, 0.0)
        o_ref[...] = out.astype(o_ref.dtype)


def prepare_adjacency(adj, *, tile_m=1024, tile_k=2048):
    """Pad + bf16-cast the normalized dense adjacency ONCE and build the
    block-sparsity metadata used for block skipping.  Reuse across forwards
    over the same graph (this is a full HBM pass over adj)."""
    n = adj.shape[0]
    assert adj.shape == (n, n)
    assert tile_m % 128 == 0 and tile_k % 128 == 0

    n128 = _round_up(max(n, 128), 128)
    tk = min(tile_k, n128)
    tm = min(tile_m, tk)
    tk = _round_up(tk, tm)            # make tm | tk
    n_pad = _round_up(n, tk)          # multiple of both tk and tm
    # v7x megacore: prefer >= 2 row tiles so both TensorCores get work.
    if n_pad // tm < 2 and n_pad >= 256 and (n_pad // 2) % 128 == 0:
        tm = n_pad // 2

    adj_p = adj
    if n_pad != n:
        adj_p = jnp.pad(adj, ((0, n_pad - n), (0, n_pad - n)))

    nb_i, nb_k = n_pad // tm, n_pad // tk
    blk_nz = (adj_p.reshape(nb_i, tm, nb_k, tk) != 0).any(axis=(1, 3))
    counts = blk_nz.sum(axis=1).astype(jnp.int32)                       # (nb_i,)
    order = jnp.argsort((~blk_nz).astype(jnp.int32), axis=1).astype(jnp.int32)
    max_blocks = max(int(counts.max()), 1)
    last_valid = jnp.take_along_axis(order,
                                     jnp.maximum(counts - 1, 0)[:, None], axis=1)
    k_iota = jnp.arange(nb_k, dtype=jnp.int32)[None, :]
    # Padded slots repeat the last valid block id: block index doesn't change,
    # so the pipeline issues no new DMA; compute is gated off by `counts`.
    bids = jnp.where(k_iota < counts[:, None], order, last_valid)[:, :max_blocks]

    # TODO(synk): on v7x, adj could optionally be stored as float8_e4m3 to halve
    # this stream again (not portable to v5e/v6e); kept bf16 for portability.
    adj_bf16 = adj_p.astype(jnp.bfloat16)   # halves the dominant HBM stream
    return dict(adj=adj_bf16, bids=bids, counts=counts, n=n, n_pad=n_pad,
                tile_m=tm, tile_k=tk, max_blocks=max_blocks,
                nnz_blocks=int(counts.sum()))


def graph_convolution(x, prep, weight, bias, *, apply_relu, out_dtype,
                      support_resident_max_bytes=16 * 1024 * 1024,
                      vmem_limit_bytes=64 * 1024 * 1024):
    """One _GraphConvolution layer on a prepared graph: adj @ (x @ W) + b."""
    adj = prep["adj"]
    bids, counts = prep["bids"], prep["counts"]
    n_pad, tm, tk = prep["n_pad"], prep["tile_m"], prep["tile_k"]
    max_blocks = prep["max_blocks"]

    f_in, f_out = weight.shape
    assert x.shape == (n_pad, f_in)
    assert bias.shape == (f_out,)

    # Hoisted out of the grid: x @ W computed exactly once per layer.
    support = jnp.dot(x, weight, preferred_element_type=jnp.float32)

    # Pad feature dim to a lane-dense multiple of 128 (unmasked vst).
    f_pad = _round_up(f_out, 128)
    if f_pad != f_out:
        support = jnp.pad(support, ((0, 0), (0, f_pad - f_out)))
        bias = jnp.pad(bias, (0, f_pad - f_out))
    support_bf16 = support.astype(jnp.bfloat16)
    bias2d = bias.reshape(1, f_pad).astype(jnp.float32)

    # Keep the whole support resident in VMEM when it fits (no per-row-tile
    # re-reads); otherwise stream the (tile_k, f_pad) slab matching each block.
    support_resident = n_pad * f_pad * 2 <= support_resident_max_bytes
    if support_resident:
        sup_spec = pl.BlockSpec((n_pad, f_pad), lambda i, k, b, c: (0, 0))
    else:
        sup_spec = pl.BlockSpec((tk, f_pad), lambda i, k, b, c: (b[i, k], 0))

    nb_i = n_pad // tm
    nnz = prep["nnz_blocks"]
    cost = pl.CostEstimate(
        flops=2 * nnz * tm * tk * f_pad,
        transcendentals=0,
        bytes_accessed=nnz * tm * tk * 2               # adj (bf16, nonzero blocks)
        + n_pad * f_pad * 2                            # support (bf16)
        + n_pad * f_pad * jnp.dtype(out_dtype).itemsize,
    )

    kernel = functools.partial(_gcn_block_kernel, apply_relu=apply_relu,
                               tile_k=tk, support_resident=support_resident)

    out = pl.pallas_call(
        kernel,
        out_shape=jax.ShapeDtypeStruct((n_pad, f_pad), out_dtype),
        grid_spec=pltpu.PrefetchScalarGridSpec(
            num_scalar_prefetch=2,
            grid=(nb_i, max_blocks),
            in_specs=[
                # (tile_m, tile_k) adj slab: row tile i, k-th NONZERO column block
                pl.BlockSpec((tm, tk), lambda i, k, b, c: (i, b[i, k])),
                sup_spec,
                pl.BlockSpec((1, f_pad), lambda i, k, b, c: (0, 0)),
            ],
            out_specs=pl.BlockSpec((tm, f_pad), lambda i, k, b, c: (i, 0)),
            scratch_shapes=[pltpu.VMEM((tm, f_pad), jnp.float32)],
        ),
        compiler_params=pltpu.CompilerParams(
            dimension_semantics=("parallel", "arbitrary"),
            vmem_limit_bytes=vmem_limit_bytes,
        ),
        cost_estimate=cost,
    )(bids, counts, adj, support_bf16, bias2d)

    if f_pad != f_out:
        out = out[:, :f_out]
    return out


def gcn_forward(x, adj, params, *, tile_m=1024, tile_k=2048, prepared=None):
    """_GCN.forward (eval mode): [dropout=identity] -> gcn -> ReLU (not last)."""
    n = x.shape[0]
    prep = prepared if prepared is not None else prepare_adjacency(
        adj, tile_m=tile_m, tile_k=tile_k)
    n_pad = prep["n_pad"]

    h = x
    if n_pad != n:
        h = jnp.pad(x, ((0, n_pad - n), (0, 0)))

    num_layers = len(params)
    for idx, (w, b) in enumerate(params):
        last = idx == num_layers - 1
        # TODO(synk): training-mode dropout (p=0.5) not implemented; eval-mode
        # forward is used (torch dropout is identity when training=False).
        h = graph_convolution(
            h, prep, w, b,
            apply_relu=not last,
            # bf16 hidden activations: halves writeback; precision is already
            # bf16-limited by the streamed adj/support. Final layer stays f32.
            out_dtype=jnp.float32 if last else jnp.bfloat16,
        )
        # TODO(synk): optional BatchNorm1d(affine=False) between hidden layers
        # not implemented (reference module default batch_norm=False).
    return h[:n]


def init_gcn_params(key, input_dim, hidden_dims, output_dim):
    """xavier_uniform_ weights, zero biases — matches _GraphConvolution.reset_parameters."""
    dims = [input_dim] + list(hidden_dims) + [output_dim]
    keys = jax.random.split(key, len(dims) - 1)
    params = []
    for k, fi, fo in zip(keys, dims[:-1], dims[1:]):
        bound = math.sqrt(6.0 / (fi + fo))
        w = jax.random.uniform(k, (fi, fo), dtype=jnp.float32,
                               minval=-bound, maxval=bound)
        b = jnp.zeros((fo,), dtype=jnp.float32)
        params.append((w, b))
    return params


if __name__ == "__main__":
    key = jax.random.PRNGKey(0)
    k_x, k_adj, k_w = jax.random.split(key, 3)

    N = 320              # deliberately not a multiple of 128 (exercises padding)
    INPUT_DIM = 64
    HIDDEN_DIMS = (48,)
    OUTPUT_DIM = 16

    x = jax.random.normal(k_x, (N, INPUT_DIM), dtype=jnp.float32)

    # Synthetic banded adjacency (edges only between nodes < 96 apart) with
    # self-loops and the same symmetric normalization as _GCN.normalize_adj on
    # a dense tensor.  The band structure exercises real block skipping.
    a = jax.random.uniform(k_adj, (N, N), dtype=jnp.float32)
    ids = jnp.arange(N)
    band = (jnp.abs(ids[:, None] - ids[None, :]) < 96).astype(jnp.float32)
    adj01 = ((a + a.T) * 0.5 > 0.8).astype(jnp.float32) * band
    adj01 = jnp.maximum(adj01, jnp.eye(N, dtype=jnp.float32))
    deg = adj01.sum(axis=1)
    dsi = 1.0 / jnp.sqrt(deg)
    adj = adj01 * dsi[:, None] * dsi[None, :]

    params = init_gcn_params(k_w, INPUT_DIM, HIDDEN_DIMS, OUTPUT_DIM)

    # Small tiles so this example exercises multi-block K accumulation, node
    # padding and block skipping.  Production defaults: tile_m=1024, tile_k=2048.
    prep = prepare_adjacency(adj, tile_m=128, tile_k=256)
    out = gcn_forward(x, adj, params, prepared=prep)
    out = jax.block_until_ready(out)
    assert out.shape == (N, OUTPUT_DIM)

    # Plain-JAX f32 reference (same semantics as the torch _GCN eval forward).
    h = x
    for i_l, (w, b) in enumerate(params):
        h = adj @ (h @ w) + b
        if i_l != len(params) - 1:
            h = jnp.maximum(h, 0.0)
    ref = h

    # Tolerance accounts for bf16 adj/support streaming + bf16 hidden activations.
    assert jnp.allclose(out.astype(jnp.float32), ref, atol=3e-2, rtol=3e-2), (
        "mismatch vs reference: max abs err "
        f"{float(jnp.max(jnp.abs(out.astype(jnp.float32) - ref)))}"
    )

    print("KERNEL_OK")
</pallas_src>

<mosaic_0001>
module attributes {stable_mosaic.version = 11 : i64} {
  func.func @_gcn_block_kernel(%arg0: i32, %arg1: i32, %arg2: memref<4x2xi32, #tpu.memory_space<smem>>, %arg3: memref<4xi32, #tpu.memory_space<smem>>, %arg4: memref<128x256xbf16, #tpu.memory_space<vmem>>, %arg5: memref<512x128xbf16, #tpu.memory_space<vmem>>, %arg6: memref<1x128xf32, #tpu.memory_space<vmem>>, %arg7: memref<128x128xbf16, #tpu.memory_space<vmem>>, %arg8: memref<128x128xf32, #tpu.memory_space<vmem>>) attributes {dimension_semantics = [#tpu.dimension_semantics<parallel>, #tpu.dimension_semantics<arbitrary>], iteration_bounds = array<i64: 4, 2>, scalar_prefetch = 2 : i64, scratch_operands = 1 : i64, tpu.core_type = #tpu.core_type<tc>, window_params = [{transform_indices = @transform_0, window_bounds = array<i64: 128, 256>}, {pipeline_mode = #tpu.pipeline_mode<synchronous>, transform_indices = @transform_1, window_bounds = array<i64: 512, 128>}, {pipeline_mode = #tpu.pipeline_mode<synchronous>, transform_indices = @transform_2, window_bounds = array<i64: 1, 128>}, {transform_indices = @transform_3, window_bounds = array<i64: 128, 128>}]} {
    %c0_i32 = arith.constant 0 : i32
    %0 = arith.cmpi eq, %arg1, %c0_i32 : i32
    %1 = arith.extui %0 : i1 to i32
    %c0_i32_0 = arith.constant 0 : i32
    %2 = arith.cmpi ne, %1, %c0_i32_0 : i32
    scf.if %2 {
      %cst = arith.constant 0.000000e+00 : f32
      %11 = vector.broadcast %cst : f32 to vector<128x128xf32>
      %c0 = arith.constant 0 : index
      %c0_3 = arith.constant 0 : index
      %12 = vector.load %arg8[%c0, %c0_3] : memref<128x128xf32, #tpu.memory_space<vmem>>, vector<128x128xf32>
      tpu.vector_store %arg8[%c0, %c0_3], %11 {strides = array<i32>} : memref<128x128xf32, #tpu.memory_space<vmem>>, vector<128x128xf32>,
    } else {
    }
    %3 = arith.index_cast %arg0 : i32 to index
    %4 = memref.load %arg3[%3] : memref<4xi32, #tpu.memory_space<smem>>
    %5 = arith.cmpi slt, %arg1, %4 : i32
    %6 = arith.extui %5 : i1 to i32
    %c0_i32_1 = arith.constant 0 : i32
    %7 = arith.cmpi ne, %6, %c0_i32_1 : i32
    scf.if %7 {
      %11 = arith.index_cast %arg0 : i32 to index
      %12 = arith.index_cast %arg1 : i32 to index
      %13 = memref.load %arg2[%11, %12] : memref<4x2xi32, #tpu.memory_space<smem>>
      %c256_i32 = arith.constant 256 : i32
      %14 = arith.muli %13, %c256_i32 : i32
      %15 = tpu.assume_multiple %14, 256 : i32
      %16 = arith.index_cast %15 : i32 to index
      %c0 = arith.constant 0 : index
      %17 = vector.load %arg5[%16, %c0] : memref<512x128xbf16, #tpu.memory_space<vmem>>, vector<256x128xbf16>
      %c0_3 = arith.constant 0 : index
      %c0_4 = arith.constant 0 : index
      %18 = vector.load %arg8[%c0_3, %c0_4] : memref<128x128xf32, #tpu.memory_space<vmem>>, vector<128x128xf32>
      %c0_5 = arith.constant 0 : index
      %c0_6 = arith.constant 0 : index
      %19 = vector.load %arg4[%c0_5, %c0_6] : memref<128x256xbf16, #tpu.memory_space<vmem>>, vector<128x256xbf16>
      %cst = arith.constant dense<0.000000e+00> : vector<128x128xf32>
      %20 = tpu.matmul %19, %17, %cst {dimension_numbers = #tpu.dot_dimension_numbers<[1], [0], [0], [1], [0, 0, 1, 1], [], []>} : vector<128x256xbf16>, vector<256x128xbf16>, vector<128x128xf32> -> vector<128x128xf32>
      %21 = arith.addf %18, %20 : vector<128x128xf32>
      %c0_7 = arith.constant 0 : index
      %c0_8 = arith.constant 0 : index
      %22 = vector.load %arg8[%c0_7, %c0_8] : memref<128x128xf32, #tpu.memory_space<vmem>>, vector<128x128xf32>
      tpu.vector_store %arg8[%c0_7, %c0_8], %21 {strides = array<i32>} : memref<128x128xf32, #tpu.memory_space<vmem>>, vector<128x128xf32>,
    } else {
    }
    %c1_i32 = arith.constant 1 : i32
    %8 = arith.cmpi eq, %arg1, %c1_i32 : i32
    %9 = arith.extui %8 : i1 to i32
    %c0_i32_2 = arith.constant 0 : i32
    %10 = arith.cmpi ne, %9, %c0_i32_2 : i32
    scf.if %10 {
      %c0 = arith.constant 0 : index
      %c0_3 = arith.constant 0 : index
      %11 = vector.load %arg8[%c0, %c0_3] : memref<128x128xf32, #tpu.memory_space<vmem>>, vector<128x128xf32>
      %c0_4 = arith.constant 0 : index
      %c0_5 = arith.constant 0 : index
      %12 = vector.load %arg6[%c0_4, %c0_5] : memref<1x128xf32, #tpu.memory_space<vmem>>, vector<1x128xf32>
      %13 = vector.broadcast %12 : vector<1x128xf32> to vector<128x128xf32>
      %14 = arith.addf %11, %13 : vector<128x128xf32>
      %cst = arith.constant 0.000000e+00 : f32
      %15 = vector.broadcast %cst : f32 to vector<128x128xf32>
      %16 = arith.maximumf %14, %15 : vector<128x128xf32>
      %17 = arith.truncf %16 : vector<128x128xf32> to vector<128x128xbf16>
      %c0_6 = arith.constant 0 : index
      %c0_7 = arith.constant 0 : index
      %18 = vector.load %arg7[%c0_6, %c0_7] : memref<128x128xbf16, #tpu.memory_space<vmem>>, vector<128x128xbf16>
      tpu.vector_store %arg7[%c0_6, %c0_7], %17 {strides = array<i32>} : memref<128x128xbf16, #tpu.memory_space<vmem>>, vector<128x128xbf16>,
    } else {
    }
    return
  }
  func.func @transform_0(%arg0: i32, %arg1: i32, %arg2: memref<4x2xi32, #tpu.memory_space<smem>>, %arg3: memref<4xi32, #tpu.memory_space<smem>>) -> (i32, i32) {
    %0 = arith.index_cast %arg0 : i32 to index
    %1 = arith.index_cast %arg1 : i32 to index
    %2 = memref.load %arg2[%0, %1] : memref<4x2xi32, #tpu.memory_space<smem>>
    %c0_i32 = arith.constant 0 : i32
    return %arg0, %2 : i32, i32
  }
  func.func @transform_1(%arg0: i32, %arg1: i32, %arg2: memref<4x2xi32, #tpu.memory_space<smem>>, %arg3: memref<4xi32, #tpu.memory_space<smem>>) -> (i32, i32) {
    %c0_i32 = arith.constant 0 : i32
    %c0_i32_0 = arith.constant 0 : i32
    %c0_i32_1 = arith.constant 0 : i32
    return %c0_i32, %c0_i32_0 : i32, i32
  }
  func.func @transform_2(%arg0: i32, %arg1: i32, %arg2: memref<4x2xi32, #tpu.memory_space<smem>>, %arg3: memref<4xi32, #tpu.memory_space<smem>>) -> (i32, i32) {
    %c0_i32 = arith.constant 0 : i32
    %c0_i32_0 = arith.constant 0 : i32
    %c0_i32_1 = arith.constant 0 : i32
    return %c0_i32, %c0_i32_0 : i32, i32
  }
  func.func @transform_3(%arg0: i32, %arg1: i32, %arg2: memref<4x2xi32, #tpu.memory_space<smem>>, %arg3: memref<4xi32, #tpu.memory_space<smem>>) -> (i32, i32) {
    %c0_i32 = arith.constant 0 : i32
    %c0_i32_0 = arith.constant 0 : i32
    return %arg0, %c0_i32 : i32, i32
  }
}

</mosaic_0001>

<bundles_post_ra>
// kernel: tpu_custom_call.1
= control target key start
LH: loop header
LB: loop body
LE: loop exit
PB: predicated region body
PF: predicated region fallthrough
CT: control target
= control target key end

     0   :  { %s1888_s0 = inlined_call_operand.vmem [shape: s32[4,2], index: 0, kind: input, shape index: {}]   ;;  %s1889_s2 = inlined_call_operand.hbm [shape: bf16[512,512], index: 2, kind: input, shape index: {}]   ;;  %s1890_s3 = inlined_call_operand.hbm [shape: bf16[512,128], index: 3, kind: input, shape index: {}]   ;;  %s1891_s4 = inlined_call_operand.vmem [shape: f32[1,128], index: 4, kind: input, shape index: {}]   ;;  %s1892_s5 = inlined_call_operand.hbm [shape: bf16[512,128], index: 5, kind: output, shape index: {}]   ;;  %s1893_s1 = inlined_call_operand.vmem [shape: s32[4], index: 1, kind: input, shape index: {}]  }
   0x1   :  { %1910 = sst [smem:[#allocation27_spill]] %s1890_s3  ;;  %s10_s20 = sshll.u32 %s1888_s0, 4  ;;  %s11_s20 = int_to_ptr.vmem [resolvable:$true] %s10_s20 }
   0x2   :  { %1911 = sst [smem:[#allocation28_spill]] %s1891_s4  ;;  %s14_s23 = sshll.u32 %s1893_s1, 4  ;;  %s15_s23 = int_to_ptr.vmem [resolvable:$true] %s14_s23 }
   0x3   :  { %1912 = sst [smem:[#allocation29_spill]] %s1892_s5  ;;  %s1317_s24 = scalar_lea.vmem %s11_s20, 64 }
   0x4   :  { %p1318_p0 = scmp.ne.s32.totalorder %s11_s20, %s1317_s24  ;;  %p1322_p1 = scmp.lt.s32.totalorder %s11_s20, %s11_s20 }
   0x5   :  { %p1323_p2 = scmp.lt.s32.totalorder %s1317_s24, %s1317_s24 }
   0x7   :  { %p1324_p3 = por %p1323_p2, %p1322_p1 }
   0x9   :  { %p1325_p4 = pnand %p1324_p3, %p1318_p0 }
   0xb   :  { %1328 = shalt.err (!%p1325_p4)  }
   0xc   :  { %s1523_s25 = smov [#allocation4]   ;;  %s1329_s26 = scalar_lea.vmem %s15_s23, 16 }
   0xd   :  { %13 = dma.vmem_to_smem %s11_s20, 64, %s1523_s25, [#allocation3] }
   0xe   :  { %p1330_p5 = scmp.ne.s32.totalorder %s15_s23, %s1329_s26  ;;  %p1334_p6 = scmp.lt.s32.totalorder %s15_s23, %s15_s23 }
   0xf   :  { %p1335_p7 = scmp.lt.s32.totalorder %s1329_s26, %s1329_s26 }
  0x11   :  { %p1336_p8 = por %p1335_p7, %p1334_p6 }
  0x13   :  { %p1337_p9 = pnand %p1336_p8, %p1330_p5 }
  0x15   :  { %1340 = shalt.err (!%p1337_p9)  }
  0x16   :  { %s1524_s0 = smov [#allocation5]  }
  0x17   :  { %17 = dma.vmem_to_smem %s15_s23, 16, %s1524_s0, [#allocation3] }
  0x18   :  { %1465 = dma.done.wait [#allocation3], 80 }
  0x19   :  { %1466 = vsyncadd [#allocation3], 4294967216 }
  0x1a   :  { %19 = sfence }
  0x1b   :  { %20 = vsyncpa [#allocation7], 0 }
  0x1c   :  { %22 = vsyncpa [#allocation7 + $0x1], 0 }
  0x1d   :  { %23 = vsyncpa [#allocation10], 0 }
  0x1e   :  { %24 = vsyncpa [#allocation8], 0 }
  0x1f   :  { %26 = vsyncpa [#allocation8 + $0x1], 0  ;;  %s1572_s1 = smov 0   ;;  %s1574_s27 = smov 0  }
  0x20   :  { %s1576_s28 = smov 0   ;;  %s1578_s29 = smov 0  }
  0x21   :  { %s1580_s30 = smov 0   ;;  %s1582_s6 = smov 0  }
  0x22   :  { %s1584_s7 = smov 0   ;;  %s1586_s8 = smov 0  }
  0x23   :  { %s1588_s9 = smov 0   ;;  %s1590_s10 = smov 0  }
  0x24   :  { %s1592_s11 = smov 0  }
  0x25 LB: > { %1913 = sst [smem:[#allocation18_spill]] %s1481_s1  ;;  %s928_s12 = sadd.s32 4294967295, %s1521_s11   ;;  %s1521_s11 = sphi %s1592_s11, %s32_s11   ;;  %s1517_s10 = sphi %s1590_s10, %s1956_s10   ;;  %s1513_s9 = sphi %s1588_s9, %s1955_s9   ;;  %s1509_s8 = sphi %s1586_s8, %s1954_s8   ;;  %s1505_s7 = sphi %s1584_s7, %s1946_s7   ;;  %s1501_s6 = sphi %s1582_s6, %s1953_s6   ;;  %s1497_s30 = sphi %s1580_s30, %s1952_s30   ;;  %s1493_s29 = sphi %s1578_s29, %s1951_s29   ;;  %s1489_s28 = sphi %s1576_s28, %s1945_s28   ;;  %s1485_s27 = sphi %s1574_s27, %s1950_s27   ;;  %s1481_s1 = sphi %s1572_s1, %s1949_s1  }
  0x26   : > { %1914 = sst [smem:[#allocation19_spill]] %s1489_s28  ;;  %s929_s13 = sadd.s32 4294967294, %s1521_s11  }
  0x27   : > { %1915 = sst [smem:[#allocation20_spill]] %s1513_s9  ;;  %p82_p10 = scmp.ne.s32.totalorder %s1497_s30, %s1493_s29 }
  0x28   : > { %1916 = sst [smem:[#allocation21_spill]] %s1521_s11  ;;  %p1630_p12 = scmp.eq.s32.totalorder %s928_s12, 0 }
  0x29   : > { %p147_p0 = scmp.ne.s32.totalorder %s1489_s28, %s1485_s27  ;;  %p148_p2 = scmp.eq.s32.totalorder %s928_s12, 7 }
  0x2a   : > { %s1917_s14 = scalar_select %p1630_p12, 1, 0 }
  0x2b   : > { %p1639_p1 = por %p1630_p12, %p82_p10  ;;  %p153_p3 = scmp.ne.s32.totalorder %s1485_s27, %s1481_s1 }
  0x2c   : > { %p154_p4 = scmp.eq.s32.totalorder %s929_s13, 7  ;;  %p1645_p5 = por %p148_p2, %p147_p0 }
  0x2d   : > { %s1918_s15 = scalar_select %p1639_p1, 1, 0 }
  0x2e   : > { %s1919_s16 = scalar_select %p1645_p5, 1, 0 }
  0x2f   : > { %p932_p6 = scmp.ge.s32.totalorder %s1521_s11, 1  ;;  %p1650_p7 = por %p154_p4, %p153_p3 }
  0x30   : > { %1920 = sst [smem:[#allocation22_spill]] %s1919_s16  ;;  %p161_p8 = scmp.lt.s32.totalorder %s1521_s11, 9 }
  0x31   : > { %s1921_s17 = scalar_select %p1650_p7, 1, 0 }
  0x32   : > { %p1655_p9 = pnand %p932_p6, %p161_p8  ;;  %s1525_s19 = smov [#allocation9]  }
  0x33   : > { %1922 = sst [smem:[#allocation23_spill]] %s1921_s17  ;;  %s173_s20 = sshll.u32 %s1525_s19, 4  ;;  %s174_s20 = int_to_ptr.vmem [resolvable:$true] %s173_s20 }
  0x34   : > { %s1923_s18 = scalar_select %p1655_p9, 1, 0 }
  0x35   : > { %p1160_p10 = pneg %p1655_p9  ;;  %s41_s22 = sadd.s32 1, %s1513_s9 }
  0x36   : > { %s1352_s23 = scalar_lea.vmem %s174_s20, 4096  ;;  %p1360_p8 = scmp.lt.s32.totalorder %s174_s20, %s174_s20 }
  0x37   : > { %p1663_p0 = pnand %p1160_p10, %p1630_p12  ;;  %p1353_p3 = scmp.ne.s32.totalorder %s174_s20, %s1352_s23 }
  0x38   : > { %p1361_p13 = scmp.lt.s32.totalorder %s1352_s23, %s1352_s23 }
  0x39   : > { %p1343_p2 = pneg %p1663_p0 }
  0x3a   : > { %p1362_p11 = por %p1361_p13, %p1360_p8 }
  0x3b   : > { %p1355_p4 = pnand %p1353_p3, %p1343_p2 }
  0x3d   : > { %p1356_p6 = pneg %p1355_p4 }
  0x3f   : > { %p1363_p7 = pnand %p1362_p11, %p1356_p6 }
  0x41   : > { %1366 = shalt.err (!%p1363_p7)
}
  0x42   : > { %s1526_s24 = smov 64   ;;  %s1527_s25 = smov 4  }
  0x43   : > { %s1925_s3 = sld [smem:[#allocation27_spill]]  ;;  %p42_p10 = scmp.ge.s32.totalorder %s41_s22, 2 }
  0x44   : > { %s44_s29 = sadd.s32 1, %s1517_s10  ;;  %s48_s12 = sshra.s32 %s1513_s9, 7 }
  0x45   : > { %s53_s13 = sand.u32 127, %s1513_s9  ;;  %s1958_s22 = smov (%p42_p10, %s41_s22), 0 }
  0x46   : > { %1926 = sst [smem:[#allocation24_spill]] %s1958_s22  ;;  %s1960_s29 = smov (!%p42_p10, %s44_s29), %s1517_s10 }
  0x47   : > { %s137_s19 = sadd.s32 1, %s1489_s28  ;;  %s50_s21 = sadd.s32 %s1517_s10, %s48_s12 }
  0x48   : > { %p46_p11 = scmp.ge.s32.totalorder %s1960_s29, 4  ;;  %s61_s26 = sand.u32 127, %s1958_s22 }
  0x49   : > { %1163 = dma.hbm_to_vmem [thread:$0]  (!%p1663_p0), %s1925_s3, 4096, %s174_s20, [#allocation10], %s1526_s24, %s1526_s24, %s1527_s25  }
  0x4a   : > { %s930_s20 = sshll.u32 %s50_s21, 7  ;;  %s56_s24 = sshra.s32 %s1958_s22, 7 }
  0x4b   : > { %s54_s23 = sadd.s32 %s930_s20, %s53_s13  ;;  %s1962_s29 = smov (%p46_p11, %s1960_s29), 0 }
  0x4c   : > { %1927 = sst [smem:[#allocation25_spill]] %s1962_s29  ;;  %s58_s0 = sadd.s32 %s56_s24, %s1962_s29 }
  0x4d   : > { %s55_s25 = sld [smem:[#allocation4 + %s54_s23]]  ;;  %s64_s3 = ssub.s32 %s1517_s10, %s1962_s29 }
  0x4e   : > { %s931_s9 = sshll.u32 %s58_s0, 7  ;;  %p135_p13 = scmp.eq.s32.totalorder %s64_s3, 0 }
  0x4f   : > { %p1928_p7 = scmp.ne.s32.totalorder %s1501_s6, %s1497_s30  ;;  %p1929_p0 = scmp.eq.s32.totalorder %s1521_s11, 0 }
  0x50   : > { %s62_s13 = sadd.s32 %s931_s9, %s61_s26  ;;  %p1175_p3 = scmp.lt.s32.totalorder %s1521_s11, 8 }
  0x51   : > { %p1695_p2 = por %p1929_p0, %p1928_p7  ;;  %s63_s21 = sld [smem:[#allocation4 + %s62_s13]] }
  0x52   : > { %s1701_s20 = scalar_select %p135_p13, %s1489_s28, %s137_s19  }
  0x53   : > { %s190_s24 = sand.u32 1, %s1501_s6   ;;  %p1706_p4 = pnand %p1175_p3, %p1695_p2 }
  0x54   : > { %1931 = sst [smem:[#allocation26_spill]] %s1701_s20  ;;  %s1964_s23 = smov (!%p1695_p2, %s54_s23), 0 }
  0x55   : > { %s1152_s29 = scalar_select %p1695_p2, [#allocation4], [#allocation12] }
  0x56   : > { %s69_s22 = sadd.s32 1, %s1501_s6  ;;  %s935_s5 = sshll.u32 %s190_s24, 7 }
  0x57   : > { %s65_s17 = ssub.s32 %s55_s25, %s63_s21  ;;  %s1966_s29 = smov (!%p1175_p3, %s1152_s29), [#allocation13] }
  0x58   : > { %s66_s1 = sor.u32 %s65_s17, %s64_s3  ;;  %s1968_s23 = smov (!%p1175_p3, %s1964_s23), 0 }
  0x59   : > { %p67_p6 = scmp.eq.s32.totalorder %s66_s1, 0  ;;  %s202_s19 = sld [smem:[%s1966_s29 + %s1968_s23]] }
  0x5a   : > { %s194_s26 = scalar_lea.vmem [#allocation6], %s935_s5  ;;  %s1005_s20 = sshll.u32 %s1517_s10, 6 }
  0x5b   : > { %s1716_s9 = scalar_select %p67_p6, %s1501_s6, %s69_s22  }
  0x5c   : > { %s212_s13 = sshll.u32 %s194_s26, 4  ;;  %s1726_s1 = scalar_lea.sflag [#allocation7], %s190_s24  ;;  %s1719_s13 = int_to_ptr.vmem [resolvable:$true] %s212_s13 }
  0x5d   : > { %p1369_p10 = pneg %p1706_p4 }
  0x5f   : > { %s938_s28 = sshll.u32 %s202_s19, 1 }
  0x60   : > { %s209_s11 = sadd.s32 %s1005_s20, %s938_s28  ;;  %s1372_s28 = scalar_lea.hbm %s1889_s2, 16384 }
  0x61   : > { %s940_s12 = sshll.u32 %s209_s11, 6 }
  0x62   : > { %s1724_s3 = scalar_lea.hbm %s1889_s2, %s940_s12 }
  0x63   : > { %s1367_s17 = scalar_lea.hbm %s1724_s3, 2048  ;;  %p1373_p7 = scmp.lt.s32.totalorder %s1724_s3, %s1889_s2 }
  0x64   : > { %p1368_p8 = scmp.ne.s32.totalorder %s1724_s3, %s1367_s17  ;;  %p1374_p0 = scmp.lt.s32.totalorder %s1372_s28, %s1367_s17 }
  0x66   : > { %p1370_p11 = pnand %p1369_p10, %p1368_p8  ;;  %p1375_p2 = por %p1374_p0, %p1373_p7 }
  0x68   : > { %p1371_p13 = pneg %p1370_p11 }
  0x6a   : > { %p1376_p3 = pnand %p1375_p2, %p1371_p13 }
  0x6c   : > { %1379 = shalt.err (!%p1376_p3)
}
  0x6d   : > { %s1380_s4 = scalar_lea.vmem %s1719_s13, 2048  ;;  %s1528_s16 = smov [#allocation6]  }
  0x6e   : > { %p1381_p6 = scmp.ne.s32.totalorder %s1719_s13, %s1380_s4  ;;  %s1385_s23 = sshll.u32 %s1528_s16, 4  ;;  %s1386_s23 = int_to_ptr.vmem [resolvable:$false] %s1385_s23 }
  0x6f   : > { %s1387_s25 = scalar_lea.vmem %s1386_s23, 4096  ;;  %p1388_p11 = scmp.lt.s32.totalorder %s1719_s13, %s1386_s23 }
  0x70   : > { %p1383_p5 = pnand %p1381_p6, %p1369_p10  ;;  %p1389_p12 = scmp.lt.s32.totalorder %s1387_s25, %s1380_s4 }
  0x72   : > { %p1384_p8 = pneg %p1383_p5  ;;  %p1390_p1 = por %p1389_p12, %p1388_p11 }
  0x74   : > { %p1391_p9 = pnand %p1390_p1, %p1384_p8 }
  0x76   : > { %1394 = shalt.err (!%p1391_p9)
}
  0x77   : > { %s1529_s21 = smov 256   ;;  %s1530_s20 = smov 128  }
  0x78   : > { %s1531_s24 = smov 8   ;;  %p1933_p5 = scmp.ne.s32.totalorder %s1923_s18, 0 }
  0x79   : > { %1169 = dma.hbm_to_vmem [thread:$0]  (!%p1706_p4), %s1724_s3, 2048, %s1719_s13, %s1726_s1, %s1529_s21, %s1530_s20, %s1531_s24  }
  0x7a   : > { %224 = sbr.rel (%p1933_p5) target bundleno = 479 (0x1df), region = 32  ;;  %s226_s19 = sand.u32 (!%p1933_p5), 1, %s1497_s30  }
  0x7b   : > { %s942_s26 = sshll.u32 (!%p1933_p5), %s226_s19, 7  ;;  %s227_s12 = scalar_lea.sflag (!%p1933_p5), [#allocation7], %s226_s19 }
  0x7c   : > { %s1750_s17 = scalar_lea.vmem (!%p1933_p5), [#allocation6], %s942_s26  ;;  %p1934_p12 = scmp.ne.s32.totalorder (!%p1933_p5), %s1918_s15, 0 }
  0x7f   : > { %1468 = dma.done.wait (%p1934_p12), %s227_s12, 2048  }
  0x80   : > { %1470 = vsyncadd (%p1934_p12), %s227_s12, 4294965248  ;;  %p1935_p1 = scmp.ne.s32.totalorder %s1917_s14, 0 }
  0x82   : > { %1472 = dma.done.wait (%p1935_p1), [#allocation10], 4096  }
  0x83   : > { %1474 = vsyncadd (%p1935_p1), [#allocation10], 4294963200  ;;  %s254_s18 = sand.u32 1, %s1485_s27   ;;  %p945_p9 = scmp.ne.s32.totalorder %s1505_s7, 0 }
  0x84   : > { %s944_s0 = sshll.u32 %s254_s18, 6 }
  0x85   : > { %s1763_s13 = scalar_lea.vmem [#allocation11], %s944_s0  ;;  %272 = sbr.rel (%p945_p9) target bundleno = 147 (0x93), region = 44 }
  0x8a   : > { %v1532_v0 = vmov 0.0  }
  0x8b   : > { %273 = vst [vmem:[#allocation2 + $0x30] sm:$0xff] %v1532_v0  ;;  %274 = vst [vmem:[#allocation2] sm:$0xff] %v1532_v0 }
  0x8c   : > { %275 = vst [vmem:[#allocation2 + $0x58] sm:$0xff] %v1532_v0  ;;  %276 = vst [vmem:[#allocation2 + $0x18] sm:$0xff] %v1532_v0 }
  0x8d   : > { %277 = vst [vmem:[#allocation2 + $0x50] sm:$0xff] %v1532_v0  ;;  %278 = vst [vmem:[#allocation2 + $0x68] sm:$0xff] %v1532_v0 }
  0x8e   : > { %279 = vst [vmem:[#allocation2 + $0x8] sm:$0xff] %v1532_v0  ;;  %280 = vst [vmem:[#allocation2 + $0x48] sm:$0xff] %v1532_v0 }
  0x8f   : > { %281 = vst [vmem:[#allocation2 + $0x40] sm:$0xff] %v1532_v0  ;;  %282 = vst [vmem:[#allocation2 + $0x20] sm:$0xff] %v1532_v0 }
  0x90   : > { %283 = vst [vmem:[#allocation2 + $0x10] sm:$0xff] %v1532_v0  ;;  %284 = vst [vmem:[#allocation2 + $0x38] sm:$0xff] %v1532_v0 }
  0x91   : > { %285 = vst [vmem:[#allocation2 + $0x60] sm:$0xff] %v1532_v0  ;;  %286 = vst [vmem:[#allocation2 + $0x70] sm:$0xff] %v1532_v0 }
  0x92   : > { %287 = vst [vmem:[#allocation2 + $0x78] sm:$0xff] %v1532_v0  ;;  %288 = vst [vmem:[#allocation2 + $0x28] sm:$0xff] %v1532_v0 }
  0x93 PF: > { %s289_s14 = sld [smem:[#allocation5 + %s1509_s8]] }
  0x99   : > { %p946_p4 = scmp.ge.s32.totalorder %s1505_s7, %s289_s14 }
  0x9a   : > { %s294_s15 = sshra.s32 (!%p946_p4), %s1505_s7, 7  ;;  %s299_s3 = sand.u32 (!%p946_p4), 127, %s1505_s7 }
  0x9b   : > { %293 = sbr.rel (%p946_p4) target bundleno = 429 (0x1ad), region = 48  ;;  %s296_s1 = sadd.s32 (!%p946_p4), %s1509_s8, %s294_s15 }
  0x9c   : > { %s947_s5 = sshll.u32 (!%p946_p4), %s296_s1, 7 }
  0x9d   : > { %s300_s22 = sadd.s32 (!%p946_p4), %s947_s5, %s299_s3 }
  0x9e   : > { %s301_s28 = sld [smem:[#allocation4 + %s300_s22]] (!%p946_p4) }
  0xa0   : > { %v1295_v1 = vld [vmem:[%s1750_s17 + $0x4] ss:$8 sps:$4 sm:$0xff]   ;;  %v1293_v19 = vld [vmem:[%s1750_s17] ss:$8 sps:$4 sm:$0xff]   ;;  %v1299_v21 = vld [vmem:[%s1750_s17 + $0x14] ss:$8 sps:$4 sm:$0xff]  }
  0xa1   : > { %v1298_v2 = vld [vmem:[%s1750_s17 + $0x44] ss:$8 sps:$4 sm:$0xff]   ;;  %579 = vmatprep.mubr.bf16.mxu0 %v1295_v1  ;;  %v1296_v20 = vld [vmem:[%s1750_s17 + $0x40] ss:$8 sps:$4 sm:$0xff]   ;;  %v1301_v22 = vld [vmem:[%s1750_s17 + $0x54] ss:$8 sps:$4 sm:$0xff]  }
  0xa2   : > { %611 = vmatprep.mubr.bf16.mxu1 %v1298_v2  ;;  %v1303_v23 = vld [vmem:[%s1750_s17 + $0x10] ss:$8 sps:$4 sm:$0xff]   ;;  %v1305_v25 = vld [vmem:[%s1750_s17 + $0x24] ss:$8 sps:$4 sm:$0xff]   ;;  %v1309_v27 = vld [vmem:[%s1750_s17 + $0x20] ss:$8 sps:$4 sm:$0xff]  }
  0xa3   : > { %v1304_v24 = vld [vmem:[%s1750_s17 + $0x50] ss:$8 sps:$4 sm:$0xff]   ;;  %v1307_v26 = vld [vmem:[%s1750_s17 + $0x64] ss:$8 sps:$4 sm:$0xff]   ;;  %v1310_v28 = vld [vmem:[%s1750_s17 + $0x60] ss:$8 sps:$4 sm:$0xff]  }
  0xa4   : > { %s948_s11 = sshll.u32 %s301_s28, 8  ;;  %v1311_v29 = vld [vmem:[%s1750_s17 + $0x34] ss:$8 sps:$4 sm:$0xff]   ;;  %v1315_v31 = vld [vmem:[%s1750_s17 + $0x30] ss:$8 sps:$4 sm:$0xff]   ;;  %v347_v37 = vld [vmem:[#allocation2 + $0x40] sm:$0xff] }
  0xa5   : > { %s303_s29 = sshra.s32 %s948_s11, 3  ;;  %v1313_v30 = vld [vmem:[%s1750_s17 + $0x74] ss:$8 sps:$4 sm:$0xff]   ;;  %v1316_v32 = vld [vmem:[%s1750_s17 + $0x70] ss:$8 sps:$4 sm:$0xff]   ;;  %v340_v45 = vld [vmem:[#allocation2] sm:$0xff] }
  0xa6   : > { %s949_s4 = sshll.u32 %s303_s29, 2  ;;  %v339_v35 = vld [vmem:[#allocation2 + $0x30] sm:$0xff]  ;;  %v348_v47 = vld [vmem:[#allocation2 + $0x20] sm:$0xff]  ;;  %v341_v55 = vld [vmem:[#allocation2 + $0x58] sm:$0xff] }
  0xa7   : > { %s1773_s16 = scalar_lea.vmem [#allocation9], %s949_s4  ;;  %v349_v57 = vld [vmem:[#allocation2 + $0x10] sm:$0xff]  ;;  %v342_v1 = vld [vmem:[#allocation2 + $0x18] sm:$0xff] }
  0xa8   : > { %v1277_v3 = vld [vmem:[%s1773_s16 + $0x78] sm:$0xff]   ;;  %v1279_v5 = vld [vmem:[%s1773_s16 + $0x70] sm:$0xff]   ;;  %v1281_v7 = vld [vmem:[%s1773_s16 + $0x68] sm:$0xff]  }
  0xa9   : > { %v1278_v4 = vld [vmem:[%s1773_s16 + $0x38] sm:$0xff]   ;;  %1070 = vmatprep.subr.bf16.mxu0 %v1277_v3  ;;  %1134 = vmatprep.subr.bf16.mxu1 %v1277_v3  ;;  %v1280_v6 = vld [vmem:[%s1773_s16 + $0x30] sm:$0xff]   ;;  %v1282_v8 = vld [vmem:[%s1773_s16 + $0x28] sm:$0xff]  }
  0xaa   : > { %1071 = vmatpush3.bf16.msra.mxu0 %v1278_v4  ;;  %1142 = vmatpush3.bf16.msra.mxu1 %v1278_v4  ;;  %v1283_v9 = vld [vmem:[%s1773_s16 + $0x60] sm:$0xff]   ;;  %v1285_v11 = vld [vmem:[%s1773_s16 + $0x58] sm:$0xff]   ;;  %v1287_v13 = vld [vmem:[%s1773_s16 + $0x50] sm:$0xff]  }
  0xab   : > { %1072 = vmatprep.subr.bf16.mxu0 %v1279_v5  ;;  %1135 = vmatprep.subr.bf16.mxu1 %v1279_v5  ;;  %v1284_v10 = vld [vmem:[%s1773_s16 + $0x20] sm:$0xff]   ;;  %v1286_v12 = vld [vmem:[%s1773_s16 + $0x18] sm:$0xff]   ;;  %v1288_v14 = vld [vmem:[%s1773_s16 + $0x10] sm:$0xff]  }
  0xac   : > { %v1289_v15 = vld [vmem:[%s1773_s16 + $0x48] sm:$0xff]   ;;  %v1291_v17 = vld [vmem:[%s1773_s16 + $0x40] sm:$0xff]   ;;  %v350_v3 = vld [vmem:[#allocation2 + $0x38] sm:$0xff] }
  0xad   : > { %v1290_v16 = vld [vmem:[%s1773_s16 + $0x8] sm:$0xff]   ;;  %v1292_v18 = vld [vmem:[%s1773_s16] sm:$0xff]  }
  0xae   : > { %1073 = vmatpush3.bf16.msra.mxu0 %v1280_v6  ;;  %1143 = vmatpush3.bf16.msra.mxu1 %v1280_v6 }
  0xaf   : > { %1074 = vmatprep.subr.bf16.mxu0 %v1281_v7  ;;  %1136 = vmatprep.subr.bf16.mxu1 %v1281_v7 }
  0xb2   : > { %1075 = vmatpush3.bf16.msra.mxu0 %v1282_v8  ;;  %1144 = vmatpush3.bf16.msra.mxu1 %v1282_v8 }
  0xb3   : > { %1076 = vmatprep.subr.bf16.mxu0 %v1283_v9  ;;  %1137 = vmatprep.subr.bf16.mxu1 %v1283_v9 }
  0xb6   : > { %1077 = vmatpush3.bf16.msra.mxu0 %v1284_v10  ;;  %1145 = vmatpush3.bf16.msra.mxu1 %v1284_v10 }
  0xb7   : > { %1078 = vmatprep.subr.bf16.mxu0 %v1285_v11  ;;  %1138 = vmatprep.subr.bf16.mxu1 %v1285_v11  ;;  %v343_v11 = vld [vmem:[#allocation2 + $0x50] sm:$0xff] }
  0xba   : > { %1079 = vmatpush3.bf16.msra.mxu0 %v1286_v12  ;;  %1146 = vmatpush3.bf16.msra.mxu1 %v1286_v12 }
  0xbb   : > { %1080 = vmatprep.subr.bf16.mxu0 %v1287_v13  ;;  %1139 = vmatprep.subr.bf16.mxu1 %v1287_v13  ;;  %v351_v13 = vld [vmem:[#allocation2 + $0x60] sm:$0xff] }
  0xbe   : > { %1081 = vmatpush3.bf16.msra.mxu0 %v1288_v14  ;;  %1147 = vmatpush3.bf16.msra.mxu1 %v1288_v14 }
  0xbf   : > { %1082 = vmatprep.subr.bf16.mxu0 %v1289_v15  ;;  %1140 = vmatprep.subr.bf16.mxu1 %v1289_v15 }
  0xc2   : > { %1083 = vmatpush3.bf16.msra.mxu0 %v1290_v16  ;;  %1148 = vmatpush3.bf16.msra.mxu1 %v1290_v16 }
  0xc3   : > { %1084 = vmatprep.subr.bf16.mxu0 %v1291_v17  ;;  %1141 = vmatprep.subr.bf16.mxu1 %v1291_v17 }
  0xc6   : > { %1085 = vmatpush3.bf16.msra.mxu0 %v1292_v18  ;;  %1149 = vmatpush3.bf16.msra.mxu1 %v1292_v18 }
  0xc9   : > { %580 = vmatmul.mubr.bf16.vlgmr.msra.gmra.mxu0 %v1293_v19  ;;  %612 = vmatmul.mubr.bf16.vlgmr.msra.gmra.mxu1 %v1296_v20 }
  0xca   : > { %587 = vmatprep.mubr.bf16.mxu0 %v1299_v21  ;;  %619 = vmatprep.mubr.bf16.mxu1 %v1301_v22  ;;  %v344_v21 = vld [vmem:[#allocation2 + $0x68] sm:$0xff] }
  0xd1   : > { %588 = vmatmul.mubr.bf16.gmra.mxu0 %v1303_v23  ;;  %620 = vmatmul.mubr.bf16.gmra.mxu1 %v1304_v24  ;;  %v352_v23 = vld [vmem:[#allocation2 + $0x70] sm:$0xff] }
  0xd2   : > { %595 = vmatprep.mubr.bf16.mxu0 %v1305_v25  ;;  %627 = vmatprep.mubr.bf16.mxu1 %v1307_v26 }
  0xd9   : > { %596 = vmatmul.mubr.bf16.gmra.mxu0 %v1309_v27  ;;  %628 = vmatmul.mubr.bf16.gmra.mxu1 %v1310_v28 }
  0xda   : > { %603 = vmatprep.mubr.bf16.mxu0 %v1311_v29  ;;  %635 = vmatprep.mubr.bf16.mxu1 %v1313_v30 }
  0xe1   : > { %604 = vmatmul.mubr.bf16.gmra.mxu0 %v1315_v31  ;;  %636 = vmatmul.mubr.bf16.gmra.mxu1 %v1316_v32  ;;  %v345_v31 = vld [vmem:[#allocation2 + $0x8] sm:$0xff] }
 0x189   : > { %v1086_v33 = vpop.f32.mrf.mxu0  ;;  %v1110_v34 = vpop.f32.mrf.mxu1 }
 0x18b   : > { %v1087_v36 = vpop.f32.mrf.mxu0  ;;  %v1111_v38 = vpop.f32.mrf.mxu1 }
 0x18c   : > { %v1088_v39 = vadd.f32 %v1087_v36, %v1086_v33  ;;  %v1112_v40 = vadd.f32 %v1111_v38, %v1110_v34  ;;  %v353_v33 = vld [vmem:[#allocation2 + $0x78] sm:$0xff] }
 0x18d   : > { %v1089_v41 = vpop.f32.mrf.mxu0  ;;  %v1113_v42 = vpop.f32.mrf.mxu1 }
 0x18e   : > { %v644_v43 = vadd.f32 %v1088_v39, %v339_v35  ;;  %v652_v44 = vadd.f32 %v1112_v40, %v347_v37 }
 0x18f   : > { %v1090_v46 = vpop.f32.mrf.mxu0  ;;  %v1114_v48 = vpop.f32.mrf.mxu1 }
 0x190   : > { %660 = vst [vmem:[#allocation2 + $0x30] sm:$0xff] %v644_v43  ;;  %668 = vst [vmem:[#allocation2 + $0x40] sm:$0xff] %v652_v44  ;;  %v1091_v49 = vadd.f32 %v1090_v46, %v1089_v41  ;;  %v1115_v50 = vadd.f32 %v1114_v48, %v1113_v42  ;;  %v346_v41 = vld [vmem:[#allocation2 + $0x48] sm:$0xff] }
 0x191   : > { %v1092_v51 = vpop.f32.mrf.mxu0  ;;  %v1116_v52 = vpop.f32.mrf.mxu1  ;;  %v354_v43 = vld [vmem:[#allocation2 + $0x28] sm:$0xff] }
 0x192   : > { %v645_v53 = vadd.f32 %v1091_v49, %v340_v45  ;;  %v653_v54 = vadd.f32 %v1115_v50, %v348_v47 }
 0x193   : > { %v1093_v56 = vpop.f32.mrf.mxu0  ;;  %v1117_v58 = vpop.f32.mrf.mxu1 }
 0x194   : > { %661 = vst [vmem:[#allocation2] sm:$0xff] %v645_v53  ;;  %669 = vst [vmem:[#allocation2 + $0x20] sm:$0xff] %v653_v54  ;;  %v1094_v59 = vadd.f32 %v1093_v56, %v1092_v51  ;;  %v1118_v60 = vadd.f32 %v1117_v58, %v1116_v52 }
 0x195   : > { %v1095_v61 = vpop.f32.mrf.mxu0  ;;  %v1119_v62 = vpop.f32.mrf.mxu1 }
 0x196   : > { %v646_v63 = vadd.f32 %v1094_v59, %v341_v55  ;;  %v654_v0 = vadd.f32 %v1118_v60, %v349_v57 }
 0x197   : > { %v1096_v2 = vpop.f32.mrf.mxu0  ;;  %v1120_v4 = vpop.f32.mrf.mxu1 }
 0x198   : > { %662 = vst [vmem:[#allocation2 + $0x58] sm:$0xff] %v646_v63  ;;  %670 = vst [vmem:[#allocation2 + $0x10] sm:$0xff] %v654_v0  ;;  %v1097_v5 = vadd.f32 %v1096_v2, %v1095_v61  ;;  %v1121_v6 = vadd.f32 %v1120_v4, %v1119_v62 }
 0x199   : > { %v1098_v7 = vpop.f32.mrf.mxu0  ;;  %v1122_v8 = vpop.f32.mrf.mxu1 }
 0x19a   : > { %v647_v9 = vadd.f32 %v1097_v5, %v342_v1  ;;  %v655_v10 = vadd.f32 %v1121_v6, %v350_v3 }
 0x19b   : > { %v1099_v12 = vpop.f32.mrf.mxu0  ;;  %v1123_v14 = vpop.f32.mrf.mxu1 }
 0x19c   : > { %663 = vst [vmem:[#allocation2 + $0x18] sm:$0xff] %v647_v9  ;;  %671 = vst [vmem:[#allocation2 + $0x38] sm:$0xff] %v655_v10  ;;  %v1100_v15 = vadd.f32 %v1099_v12, %v1098_v7  ;;  %v1124_v16 = vadd.f32 %v1123_v14, %v1122_v8 }
 0x19d   : > { %v1101_v17 = vpop.f32.mrf.mxu0  ;;  %v1125_v18 = vpop.f32.mrf.mxu1 }
 0x19e   : > { %v648_v19 = vadd.f32 %v1100_v15, %v343_v11  ;;  %v656_v20 = vadd.f32 %v1124_v16, %v351_v13 }
 0x19f   : > { %v1102_v22 = vpop.f32.mrf.mxu0  ;;  %v1126_v24 = vpop.f32.mrf.mxu1 }
 0x1a0   : > { %664 = vst [vmem:[#allocation2 + $0x50] sm:$0xff] %v648_v19  ;;  %672 = vst [vmem:[#allocation2 + $0x60] sm:$0xff] %v656_v20  ;;  %v1103_v25 = vadd.f32 %v1102_v22, %v1101_v17  ;;  %v1127_v26 = vadd.f32 %v1126_v24, %v1125_v18 }
 0x1a1   : > { %v1104_v27 = vpop.f32.mrf.mxu0  ;;  %v1128_v28 = vpop.f32.mrf.mxu1 }
 0x1a2   : > { %v649_v29 = vadd.f32 %v1103_v25, %v344_v21  ;;  %v657_v30 = vadd.f32 %v1127_v26, %v352_v23 }
 0x1a3   : > { %v1105_v32 = vpop.f32.mrf.mxu0  ;;  %v1129_v34 = vpop.f32.mrf.mxu1 }
 0x1a4   : > { %665 = vst [vmem:[#allocation2 + $0x68] sm:$0xff] %v649_v29  ;;  %673 = vst [vmem:[#allocation2 + $0x70] sm:$0xff] %v657_v30  ;;  %v1106_v35 = vadd.f32 %v1105_v32, %v1104_v27  ;;  %v1130_v36 = vadd.f32 %v1129_v34, %v1128_v28 }
 0x1a5   : > { %v1107_v37 = vpop.f32.mrf.mxu0  ;;  %v1131_v38 = vpop.f32.mrf.mxu1 }
 0x1a6   : > { %v650_v39 = vadd.f32 %v1106_v35, %v345_v31  ;;  %v658_v40 = vadd.f32 %v1130_v36, %v353_v33 }
 0x1a7   : > { %v1108_v42 = vpop.f32.mrf.mxu0  ;;  %v1132_v44 = vpop.f32.mrf.mxu1 }
 0x1a8   : > { %666 = vst [vmem:[#allocation2 + $0x8] sm:$0xff] %v650_v39  ;;  %674 = vst [vmem:[#allocation2 + $0x78] sm:$0xff] %v658_v40  ;;  %v1109_v45 = vadd.f32 %v1108_v42, %v1107_v37  ;;  %v1133_v46 = vadd.f32 %v1132_v44, %v1131_v38 }
 0x1aa   : > { %v651_v47 = vadd.f32 %v1109_v45, %v346_v41  ;;  %v659_v48 = vadd.f32 %v1133_v46, %v354_v43 }
 0x1ac   : > { %667 = vst [vmem:[#allocation2 + $0x48] sm:$0xff] %v651_v47  ;;  %675 = vst [vmem:[#allocation2 + $0x28] sm:$0xff] %v659_v48 }
 0x1ad PF: > { %p982_p10 = scmp.ne.s32.totalorder %s1505_s7, 1 }
 0x1ae   : > { %s1936_s21 = sld [smem:[#allocation28_spill]] (!%p982_p10) }
 0x1af   : > { %679 = sbr.rel (%p982_p10) target bundleno = 452 (0x1c4), region = 52 }
 0x1b4   : > { %v680_v49 = vld [vmem:[#allocation2 + $0x30] sm:$0xff]  ;;  %v681_v50 = vld [vmem:[#allocation2] sm:$0xff]  ;;  %v682_v54 = vld [vmem:[#allocation2 + $0x58] sm:$0xff] }
 0x1b5   : > { %v983_v51 = vld [vmem:[%s1936_s21] ss:$0 sm:$0xff]  ;;  %v683_v55 = vld [vmem:[#allocation2 + $0x18] sm:$0xff]  ;;  %v684_v56 = vld [vmem:[#allocation2 + $0x50] sm:$0xff] }
 0x1b6   : > { %v703_v52 = vadd.f32 %v983_v51, %v680_v49  ;;  %v704_v53 = vadd.f32 %v983_v51, %v681_v50  ;;  %v705_v57 = vadd.f32 %v983_v51, %v682_v54  ;;  %v706_v58 = vadd.f32 %v983_v51, %v683_v55  ;;  %v685_v59 = vld [vmem:[#allocation2 + $0x68] sm:$0xff]  ;;  %v688_v3 = vld [vmem:[#allocation2 + $0x40] sm:$0xff]  ;;  %v690_v5 = vld [vmem:[#allocation2 + $0x10] sm:$0xff] }
 0x1b7   : > { %v707_v60 = vadd.f32 %v983_v51, %v684_v56  ;;  %v686_v61 = vld [vmem:[#allocation2 + $0x8] sm:$0xff]  ;;  %v708_v1 = vadd.f32 %v983_v51, %v685_v59  ;;  %v689_v4 = vld [vmem:[#allocation2 + $0x20] sm:$0xff]  ;;  %v691_v10 = vld [vmem:[#allocation2 + $0x38] sm:$0xff]  ;;  %v711_v15 = vadd.f32 %v983_v51, %v688_v3  ;;  %v713_v20 = vadd.f32 %v983_v51, %v690_v5 }
 0x1b8   : > { %v687_v62 = vld [vmem:[#allocation2 + $0x48] sm:$0xff]  ;;  %v719_v63 = vmax.f32 %v703_v52, 0.0  ;;  %v720_v0 = vmax.f32 %v704_v53, 0.0  ;;  %v709_v2 = vadd.f32 %v983_v51, %v686_v61  ;;  %v721_v6 = vmax.f32 %v705_v57, 0.0  ;;  %v692_v11 = vld [vmem:[#allocation2 + $0x60] sm:$0xff]  ;;  %v693_v16 = vld [vmem:[#allocation2 + $0x70] sm:$0xff] }
 0x1b9   : > { %v722_v7 = vmax.f32 %v706_v58, 0.0  ;;  %v723_v8 = vmax.f32 %v707_v60, 0.0  ;;  %v710_v9 = vadd.f32 %v983_v51, %v687_v62  ;;  %v724_v13 = vmax.f32 %v708_v1, 0.0  ;;  %v694_v21 = vld [vmem:[#allocation2 + $0x78] sm:$0xff]  ;;  %v695_v22 = vld [vmem:[#allocation2 + $0x28] sm:$0xff] }
 0x1ba   : > { %v1026_v12 = vpack.c.bf16 %v720_v0, %v719_v63  ;;  %v725_v14 = vmax.f32 %v709_v2, 0.0  ;;  %v712_v19 = vadd.f32 %v983_v51, %v689_v4  ;;  %v727_v24 = vmax.f32 %v711_v15, 0.0 }
 0x1bb   : > { %v1031_v17 = vpack.c.bf16 %v722_v7, %v721_v6  ;;  %v726_v18 = vmax.f32 %v710_v9, 0.0  ;;  %v1036_v23 = vpack.c.bf16 %v724_v13, %v723_v8  ;;  %v714_v25 = vadd.f32 %v983_v51, %v691_v10 }
 0x1bc   : > { %1027 = vst [vmem:[%s1763_s13] sm:$0xff] %v1026_v12   ;;  %v715_v26 = vadd.f32 %v983_v51, %v692_v11  ;;  %v728_v28 = vmax.f32 %v712_v19, 0.0  ;;  %v729_v29 = vmax.f32 %v713_v20, 0.0  ;;  %v716_v30 = vadd.f32 %v983_v51, %v693_v16 }
 0x1bd   : > { %1063 = vst [vmem:[%s1763_s13 + $0x8] sm:$0xff] %v1031_v17   ;;  %v1041_v27 = vpack.c.bf16 %v726_v18, %v725_v14  ;;  %1064 = vst [vmem:[%s1763_s13 + $0x10] sm:$0xff] %v1036_v23   ;;  %v730_v31 = vmax.f32 %v714_v25, 0.0  ;;  %v717_v33 = vadd.f32 %v983_v51, %v694_v21  ;;  %v718_v34 = vadd.f32 %v983_v51, %v695_v22 }
 0x1be   : > { %v731_v32 = vmax.f32 %v715_v26, 0.0  ;;  %v1046_v35 = vpack.c.bf16 %v728_v28, %v727_v24  ;;  %v732_v36 = vmax.f32 %v716_v30, 0.0 }
 0x1bf   : > { %1065 = vst [vmem:[%s1763_s13 + $0x18] sm:$0xff] %v1041_v27   ;;  %v1051_v37 = vpack.c.bf16 %v730_v31, %v729_v29  ;;  %v733_v38 = vmax.f32 %v717_v33, 0.0  ;;  %v734_v39 = vmax.f32 %v718_v34, 0.0 }
 0x1c0   : > { %1066 = vst [vmem:[%s1763_s13 + $0x20] sm:$0xff] %v1046_v35   ;;  %v1056_v40 = vpack.c.bf16 %v732_v36, %v731_v32 }
 0x1c1   : > { %1067 = vst [vmem:[%s1763_s13 + $0x28] sm:$0xff] %v1051_v37   ;;  %v1061_v41 = vpack.c.bf16 %v734_v39, %v733_v38 }
 0x1c2   : > { %1068 = vst [vmem:[%s1763_s13 + $0x30] sm:$0xff] %v1056_v40  }
 0x1c3   : > { %1069 = vst [vmem:[%s1763_s13 + $0x38] sm:$0xff] %v1061_v41  }
 0x1c4 PF: > { %s1937_s7 = sld [smem:[#allocation22_spill]]  ;;  %s1022_s20 = sshll.u32 %s1509_s8, 10 }
 0x1c5   : > { %s1938_s26 = sld [smem:[#allocation29_spill]]  ;;  %s829_s17 = sshll.u32 %s1763_s13, 4  ;;  %s1824_s17 = int_to_ptr.vmem [resolvable:$true] %s829_s17 }
 0x1c6   : > { %s1828_s0 = scalar_lea.sflag [#allocation8], %s254_s18  ;;  %s1395_s14 = scalar_lea.vmem %s1824_s17, 1024 }
 0x1c7   : > { %p1396_p13 = scmp.ne.s32.totalorder %s1824_s17, %s1395_s14  ;;  %s1533_s8 = smov [#allocation11]  }
 0x1c8   : > { %s1399_s15 = sshll.u32 %s1533_s8, 4  ;;  %s1400_s15 = int_to_ptr.vmem [resolvable:$false] %s1399_s15 }
 0x1c9   : > { %s1401_s3 = scalar_lea.vmem %s1400_s15, 2048  ;;  %p1402_p3 = scmp.lt.s32.totalorder %s1824_s17, %s1400_s15 }
 0x1ca   : > { %p1939_p7 = scmp.ne.s32.totalorder %s1937_s7, 0  ;;  %p1403_p6 = scmp.lt.s32.totalorder %s1401_s3, %s1395_s14 }
 0x1cb   : > { %s1821_s12 = scalar_lea.hbm %s1938_s26, %s1022_s20 }
 0x1cc   : > { %p1397_p0 = pnand %p1396_p13, %p1939_p7  ;;  %p1404_p8 = por %p1403_p6, %p1402_p3 }
 0x1ce   : > { %p1398_p2 = pneg %p1397_p0 }
 0x1d0   : > { %p1405_p11 = pnand %p1404_p8, %p1398_p2 }
 0x1d2   : > { %1408 = shalt.err (!%p1405_p11)
}
 0x1d3   : > { %s1409_s18 = scalar_lea.hbm %s1821_s12, 1024  ;;  %s1413_s5 = scalar_lea.hbm %s1938_s26, 4096 }
 0x1d4   : > { %p1410_p5 = scmp.ne.s32.totalorder %s1821_s12, %s1409_s18  ;;  %p1414_p9 = scmp.lt.s32.totalorder %s1821_s12, %s1938_s26 }
 0x1d5   : > { %p1415_p4 = scmp.lt.s32.totalorder %s1413_s5, %s1409_s18 }
 0x1d6   : > { %p1411_p12 = pnand %p1410_p5, %p1939_p7 }
 0x1d7   : > { %p1416_p10 = por %p1415_p4, %p1414_p9 }
 0x1d8   : > { %p1412_p1 = pneg %p1411_p12 }
 0x1da   : > { %p1417_p13 = pnand %p1416_p10, %p1412_p1 }
 0x1dc   : > { %1420 = shalt.err (!%p1417_p13)
}
 0x1dd   : > { %s1534_s11 = smov 64   ;;  %s1535_s29 = smov 4  }
 0x1de   : > { %1158 = dma.vmem_to_hbm [thread:$0]  (%p1939_p7), %s1824_s17, 1024, %s1821_s12, %s1828_s0, %s1534_s11, %s1534_s11, %s1535_s29  }
 0x1df PF: > { %s1940_s4 = sld [smem:[#allocation21_spill]] }
 0x1e0   : > { %s1941_s16 = sld [smem:[#allocation18_spill]] }
 0x1e1   : > { %s1942_s23 = sld [smem:[#allocation23_spill]] }
 0x1e5   : > { %p1177_p0 = scmp.ge.s32.totalorder %s1940_s4, 2 }
 0x1e6   : > { %s844_s25 = sand.u32 1, %s1941_s16  }
 0x1e7   : > { %p1943_p2 = scmp.ne.s32.totalorder %s1942_s23, 0  ;;  %s845_s21 = scalar_lea.sflag [#allocation8], %s844_s25 }
 0x1e9   : > { %p1171_p3 = pnand %p1177_p0, %p1943_p2 }
 0x1eb   : > { %p1172_p6 = pneg %p1171_p3 }
 0x1ed   : > { %1476 = dma.done.wait (%p1172_p6), %s845_s21, 1024  }
 0x1ee   : > { %1478 = vsyncadd (%p1172_p6), %s845_s21, 4294966272  ;;  %s32_s11 = sadd.s32 1, %s1940_s4   ;;  %s1944_s20 = sld [smem:[#allocation19_spill]] }
 0x1ef   : > { %p29_p8 = scmp.ge.s32.totalorder %s32_s11, 10   ;;  %s1945_s28 = sld [smem:[#allocation26_spill]] }
 0x1f0   : > { %s1946_s7 = sld [smem:[#allocation20_spill]]  ;;  %s1949_s1 = smov %s1485_s27 }
 0x1f1   : > { %s1947_s24 = sld [smem:[#allocation24_spill]]  ;;  %s1951_s29 = smov %s1497_s30 }
 0x1f2   : > { %s1948_s19 = sld [smem:[#allocation25_spill]]  ;;  %s1952_s30 = smov %s1501_s6 }
 0x1f3   : > { %s1953_s6 = smov %s1716_s9  ;;  %s1954_s8 = smov %s1517_s10 }
 0x1f4   : > { %s1950_s27 = smov %s1944_s20  ;;  %31 = sbr.rel (!%p29_p8) target bundleno = 37 (0x25), region = 94 }
 0x1f7   : > { %s1955_s9 = smov %s1947_s24 }
 0x1f8   : > { %s1956_s10 = smov %s1948_s19 }
 0x1f9   :  { %850 = vsyncpa [#allocation7], 1 }
 0x1fa   :  { %852 = vsyncpa [#allocation7 + $0x1], 1 }
 0x1fb   :  { %853 = vsyncpa [#allocation10], 1 }
 0x1fc   :  { %854 = vsyncpa [#allocation8], 1 }
 0x1fd   :  { %856 = vsyncpa [#allocation8 + $0x1], 1 }

</bundles_post_ra>
